<compile_context>
chip_gen: v6e
topology: v6e:2x2x1
jax: 0.10.0
libtpu: 0.0.40
codegen_flags: <defaults>
</compile_context>

<pallas_src>
import functools

import jax
import jax.numpy as jnp
from jax.experimental import pallas as pl
from jax.experimental.pallas import tpu as pltpu

LANE = 128
SUBLANE = 8


def _round_up(x, m):
    return (x + m - 1) // m * m


# ----------------------------- Fused Pallas kernel ---------------------------

def _fused_mlp_kernel(n_hidden, *refs):
    """refs = (x, w0, b0, w1, b1, ..., w_pre, b_pre, pre_0, ..., pre_{H-1}, out).

    All weights are pre-transposed [in_pad, out_pad] and zero-padded to
    lane-dense (multiple-of-128) widths, so every matmul is a plain row-major
    MXU op and every store is unmasked.
    """
    n_layers = n_hidden + 1
    x_ref = refs[0]
    w_refs = refs[1:1 + 2 * n_layers:2]
    b_refs = refs[2:2 + 2 * n_layers:2]
    out_refs = refs[1 + 2 * n_layers:]

    act = x_ref[...]                                   # (tm, d_in) f32
    for i in range(n_hidden):
        pre = jnp.dot(act, w_refs[i][...],
                      preferred_element_type=jnp.float32) + b_refs[i][...]
        out_refs[i][...] = pre                         # lane-dense (tm, 128k)
        act = jnp.maximum(pre, 0.0)                    # stays in VMEM/vregs
        # i == 0: dropout(0.1) -> identity in eval mode.
    out_refs[n_hidden][...] = (
        jnp.dot(act, w_refs[n_hidden][...],
                preferred_element_type=jnp.float32) + b_refs[n_hidden][...])


# --------------------------- Parameter init (glue) ---------------------------

def _kaiming_uniform(key, fan_in, fan_out):
    # nn.init.kaiming_uniform_(w, a=0, mode='fan_in', nonlinearity='relu')
    # bound = sqrt(6 / fan_in); torch weight is (out, in) — we build the
    # transposed (in, out) layout directly.
    bound = jnp.sqrt(6.0 / fan_in)
    return jax.random.uniform(key, (fan_in, fan_out), jnp.float32, -bound, bound)


def _bias_uniform(key, fan_in, fan_out):
    # PyTorch Linear default bias init: U(-1/sqrt(fan_in), 1/sqrt(fan_in))
    bound = 1.0 / jnp.sqrt(jnp.float32(fan_in))
    return jax.random.uniform(key, (fan_out,), jnp.float32, -bound, bound)


def init_sdnn_params(key, size):
    params = []
    for i in range(len(size) - 1):
        key, kw, kb = jax.random.split(key, 3)
        w_t = _kaiming_uniform(kw, size[i], size[i + 1])
        b = _bias_uniform(kb, size[i], size[i + 1])
        params.append((w_t, b))
    return params


# ------------------------------- Forward pass --------------------------------

def sdnn_forward(params, y, *, tile_m=512):
    """Replicates S_DNN.forward (bn=False, eval-mode dropout) with ONE
    pallas_call. Returns (out, layer_input, prea)."""
    n_layers = len(params)
    n_hidden = n_layers - 1
    n, d_in = y.shape

    out_dims = [w.shape[1] for (w, _) in params]           # true widths
    pad_dims = [_round_up(d, LANE) for d in out_dims]      # lane-dense widths

    # ---- pad parameters once (zero rows/cols => numerically identical) ----
    padded = []
    in_pad = d_in
    for (w_t, b), dpad in zip(params, pad_dims):
        din, dout = w_t.shape
        w_pad = jnp.zeros((in_pad, dpad), jnp.float32).at[:din, :dout].set(w_t)
        b_pad = jnp.zeros((1, dpad), jnp.float32).at[0, :dout].set(b)
        padded.append((w_pad, b_pad))
        in_pad = dpad

    # ---- batch tiling (grid over rows; parallel for v7x dual-TC) ----
    tm = min(_round_up(n, SUBLANE), tile_m)
    n_pad = _round_up(n, tm)
    y_p = y if n_pad == n else jnp.zeros((n_pad, d_in), y.dtype).at[:n].set(y)
    grid = (n_pad // tm,)

    in_specs = [pl.BlockSpec((tm, d_in), lambda i: (i, 0))]
    flat_inputs = [y_p]
    for (w_pad, b_pad) in padded:
        in_specs.append(pl.BlockSpec(w_pad.shape, lambda i: (0, 0)))
        in_specs.append(pl.BlockSpec(b_pad.shape, lambda i: (0, 0)))
        flat_inputs += [w_pad, b_pad]

    out_shape = tuple(jax.ShapeDtypeStruct((n_pad, dpad), jnp.float32)
                      for dpad in pad_dims)
    out_specs = tuple(pl.BlockSpec((tm, dpad), lambda i: (i, 0))
                      for dpad in pad_dims)

    outs = pl.pallas_call(
        functools.partial(_fused_mlp_kernel, n_hidden),
        grid=grid,
        in_specs=in_specs,
        out_specs=out_specs,
        out_shape=out_shape,
        compiler_params=pltpu.CompilerParams(
            dimension_semantics=("parallel",),
            vmem_limit_bytes=32 * 1024 * 1024,   # safe on v5e/v6e/v7x
        ),
    )(*flat_inputs)

    # ---- strip padding; rebuild the PyTorch return structure ----
    pres = [o[:n, :d] for o, d in zip(outs[:n_hidden], out_dims[:n_hidden])]
    out = outs[n_hidden][:n, :out_dims[-1]]
    prea = [y] + pres
    layer_input = [y] + [jnp.maximum(p, 0.0) for p in pres]
    return out, layer_input, prea


# ---------------------------------- Main -------------------------------------

if __name__ == "__main__":
    size = [32, 64, 64, 16]   # S_DNN(size): 2 hidden layers + prediction layer
    batch = 8

    key = jax.random.PRNGKey(0)
    kx, kp = jax.random.split(key)
    y_in = jax.random.normal(kx, (batch, size[0]), jnp.float32)
    params = init_sdnn_params(kp, size)

    out, layer_input, prea = sdnn_forward(params, y_in)
    jax.block_until_ready(out)
    jax.block_until_ready(layer_input)
    jax.block_until_ready(prea)

    # Plain-JAX reference.
    ref = y_in
    ref_prea = [y_in]
    for i in range(len(params) - 1):
        p = ref @ params[i][0] + params[i][1]
        ref_prea.append(p)
        ref = jnp.maximum(p, 0.0)
    ref_out = ref @ params[-1][0] + params[-1][1]

    assert out.shape == (batch, size[-1])
    assert len(layer_input) == len(size) - 1 and len(prea) == len(size) - 1
    assert jnp.allclose(out, ref_out, atol=1e-5, rtol=1e-5)
    for got, want in zip(prea[1:], ref_prea[1:]):
        assert jnp.allclose(got, want, atol=1e-5, rtol=1e-5)
    for got, want in zip(layer_input[1:], ref_prea[1:]):
        assert jnp.allclose(got, jnp.maximum(want, 0.0), atol=1e-5, rtol=1e-5)

    print("KERNEL_OK")
</pallas_src>

<mosaic_0001>
module attributes {stable_mosaic.version = 11 : i64} {
  func.func @_fused_mlp_kernel(%arg0: i32, %arg1: memref<8x32xf32, #tpu.memory_space<vmem>>, %arg2: memref<32x128xf32, #tpu.memory_space<vmem>>, %arg3: memref<1x128xf32, #tpu.memory_space<vmem>>, %arg4: memref<128x128xf32, #tpu.memory_space<vmem>>, %arg5: memref<1x128xf32, #tpu.memory_space<vmem>>, %arg6: memref<128x128xf32, #tpu.memory_space<vmem>>, %arg7: memref<1x128xf32, #tpu.memory_space<vmem>>, %arg8: memref<8x128xf32, #tpu.memory_space<vmem>>, %arg9: memref<8x128xf32, #tpu.memory_space<vmem>>, %arg10: memref<8x128xf32, #tpu.memory_space<vmem>>) attributes {dimension_semantics = [#tpu.dimension_semantics<parallel>], iteration_bounds = array<i64: 1>, scalar_prefetch = 0 : i64, scratch_operands = 0 : i64, tpu.core_type = #tpu.core_type<tc>, window_params = [{transform_indices = @transform_0, window_bounds = array<i64: 8, 32>}, {pipeline_mode = #tpu.pipeline_mode<synchronous>, transform_indices = @transform_1, window_bounds = array<i64: 32, 128>}, {pipeline_mode = #tpu.pipeline_mode<synchronous>, transform_indices = @transform_2, window_bounds = array<i64: 1, 128>}, {pipeline_mode = #tpu.pipeline_mode<synchronous>, transform_indices = @transform_3, window_bounds = array<i64: 128, 128>}, {pipeline_mode = #tpu.pipeline_mode<synchronous>, transform_indices = @transform_4, window_bounds = array<i64: 1, 128>}, {pipeline_mode = #tpu.pipeline_mode<synchronous>, transform_indices = @transform_5, window_bounds = array<i64: 128, 128>}, {pipeline_mode = #tpu.pipeline_mode<synchronous>, transform_indices = @transform_6, window_bounds = array<i64: 1, 128>}, {transform_indices = @transform_7, window_bounds = array<i64: 8, 128>}, {transform_indices = @transform_8, window_bounds = array<i64: 8, 128>}, {transform_indices = @transform_9, window_bounds = array<i64: 8, 128>}]} {
    %c0 = arith.constant 0 : index
    %c0_0 = arith.constant 0 : index
    %0 = vector.load %arg1[%c0, %c0_0] : memref<8x32xf32, #tpu.memory_space<vmem>>, vector<8x32xf32>
    %c0_1 = arith.constant 0 : index
    %c0_2 = arith.constant 0 : index
    %1 = vector.load %arg2[%c0_1, %c0_2] : memref<32x128xf32, #tpu.memory_space<vmem>>, vector<32x128xf32>
    %cst = arith.constant dense<0.000000e+00> : vector<8x128xf32>
    %2 = tpu.matmul %0, %1, %cst {dimension_numbers = #tpu.dot_dimension_numbers<[1], [0], [0], [1], [0, 0, 1, 1], [], []>} : vector<8x32xf32>, vector<32x128xf32>, vector<8x128xf32> -> vector<8x128xf32>
    %c0_3 = arith.constant 0 : index
    %c0_4 = arith.constant 0 : index
    %3 = vector.load %arg3[%c0_3, %c0_4] : memref<1x128xf32, #tpu.memory_space<vmem>>, vector<1x128xf32>
    %4 = vector.broadcast %3 : vector<1x128xf32> to vector<8x128xf32>
    %5 = arith.addf %2, %4 : vector<8x128xf32>
    %c0_5 = arith.constant 0 : index
    %c0_6 = arith.constant 0 : index
    %6 = vector.load %arg8[%c0_5, %c0_6] : memref<8x128xf32, #tpu.memory_space<vmem>>, vector<8x128xf32>
    tpu.vector_store %arg8[%c0_5, %c0_6], %5 {strides = array<i32>} : memref<8x128xf32, #tpu.memory_space<vmem>>, vector<8x128xf32>,
    %cst_7 = arith.constant 0.000000e+00 : f32
    %7 = vector.broadcast %cst_7 : f32 to vector<8x128xf32>
    %8 = arith.maximumf %5, %7 : vector<8x128xf32>
    %c0_8 = arith.constant 0 : index
    %c0_9 = arith.constant 0 : index
    %9 = vector.load %arg4[%c0_8, %c0_9] : memref<128x128xf32, #tpu.memory_space<vmem>>, vector<128x128xf32>
    %cst_10 = arith.constant dense<0.000000e+00> : vector<8x128xf32>
    %10 = tpu.matmul %8, %9, %cst_10 {dimension_numbers = #tpu.dot_dimension_numbers<[1], [0], [0], [1], [0, 0, 1, 1], [], []>} : vector<8x128xf32>, vector<128x128xf32>, vector<8x128xf32> -> vector<8x128xf32>
    %c0_11 = arith.constant 0 : index
    %c0_12 = arith.constant 0 : index
    %11 = vector.load %arg5[%c0_11, %c0_12] : memref<1x128xf32, #tpu.memory_space<vmem>>, vector<1x128xf32>
    %12 = vector.broadcast %11 : vector<1x128xf32> to vector<8x128xf32>
    %13 = arith.addf %10, %12 : vector<8x128xf32>
    %c0_13 = arith.constant 0 : index
    %c0_14 = arith.constant 0 : index
    %14 = vector.load %arg9[%c0_13, %c0_14] : memref<8x128xf32, #tpu.memory_space<vmem>>, vector<8x128xf32>
    tpu.vector_store %arg9[%c0_13, %c0_14], %13 {strides = array<i32>} : memref<8x128xf32, #tpu.memory_space<vmem>>, vector<8x128xf32>,
    %cst_15 = arith.constant 0.000000e+00 : f32
    %15 = vector.broadcast %cst_15 : f32 to vector<8x128xf32>
    %16 = arith.maximumf %13, %15 : vector<8x128xf32>
    %c0_16 = arith.constant 0 : index
    %c0_17 = arith.constant 0 : index
    %17 = vector.load %arg6[%c0_16, %c0_17] : memref<128x128xf32, #tpu.memory_space<vmem>>, vector<128x128xf32>
    %cst_18 = arith.constant dense<0.000000e+00> : vector<8x128xf32>
    %18 = tpu.matmul %16, %17, %cst_18 {dimension_numbers = #tpu.dot_dimension_numbers<[1], [0], [0], [1], [0, 0, 1, 1], [], []>} : vector<8x128xf32>, vector<128x128xf32>, vector<8x128xf32> -> vector<8x128xf32>
    %c0_19 = arith.constant 0 : index
    %c0_20 = arith.constant 0 : index
    %19 = vector.load %arg7[%c0_19, %c0_20] : memref<1x128xf32, #tpu.memory_space<vmem>>, vector<1x128xf32>
    %20 = vector.broadcast %19 : vector<1x128xf32> to vector<8x128xf32>
    %21 = arith.addf %18, %20 : vector<8x128xf32>
    %c0_21 = arith.constant 0 : index
    %c0_22 = arith.constant 0 : index
    %22 = vector.load %arg10[%c0_21, %c0_22] : memref<8x128xf32, #tpu.memory_space<vmem>>, vector<8x128xf32>
    tpu.vector_store %arg10[%c0_21, %c0_22], %21 {strides = array<i32>} : memref<8x128xf32, #tpu.memory_space<vmem>>, vector<8x128xf32>,
    return
  }
  func.func @transform_0(%arg0: i32) -> (i32, i32) {
    %c0_i32 = arith.constant 0 : i32
    %c0_i32_0 = arith.constant 0 : i32
    return %arg0, %c0_i32 : i32, i32
  }
  func.func @transform_1(%arg0: i32) -> (i32, i32) {
    %c0_i32 = arith.constant 0 : i32
    %c0_i32_0 = arith.constant 0 : i32
    %c0_i32_1 = arith.constant 0 : i32
    return %c0_i32, %c0_i32_0 : i32, i32
  }
  func.func @transform_2(%arg0: i32) -> (i32, i32) {
    %c0_i32 = arith.constant 0 : i32
    %c0_i32_0 = arith.constant 0 : i32
    %c0_i32_1 = arith.constant 0 : i32
    return %c0_i32, %c0_i32_0 : i32, i32
  }
  func.func @transform_3(%arg0: i32) -> (i32, i32) {
    %c0_i32 = arith.constant 0 : i32
    %c0_i32_0 = arith.constant 0 : i32
    %c0_i32_1 = arith.constant 0 : i32
    return %c0_i32, %c0_i32_0 : i32, i32
  }
  func.func @transform_4(%arg0: i32) -> (i32, i32) {
    %c0_i32 = arith.constant 0 : i32
    %c0_i32_0 = arith.constant 0 : i32
    %c0_i32_1 = arith.constant 0 : i32
    return %c0_i32, %c0_i32_0 : i32, i32
  }
  func.func @transform_5(%arg0: i32) -> (i32, i32) {
    %c0_i32 = arith.constant 0 : i32
    %c0_i32_0 = arith.constant 0 : i32
    %c0_i32_1 = arith.constant 0 : i32
    return %c0_i32, %c0_i32_0 : i32, i32
  }
  func.func @transform_6(%arg0: i32) -> (i32, i32) {
    %c0_i32 = arith.constant 0 : i32
    %c0_i32_0 = arith.constant 0 : i32
    %c0_i32_1 = arith.constant 0 : i32
    return %c0_i32, %c0_i32_0 : i32, i32
  }
  func.func @transform_7(%arg0: i32) -> (i32, i32) {
    %c0_i32 = arith.constant 0 : i32
    %c0_i32_0 = arith.constant 0 : i32
    return %arg0, %c0_i32 : i32, i32
  }
  func.func @transform_8(%arg0: i32) -> (i32, i32) {
    %c0_i32 = arith.constant 0 : i32
    %c0_i32_0 = arith.constant 0 : i32
    return %arg0, %c0_i32 : i32, i32
  }
  func.func @transform_9(%arg0: i32) -> (i32, i32) {
    %c0_i32 = arith.constant 0 : i32
    %c0_i32_0 = arith.constant 0 : i32
    return %arg0, %c0_i32 : i32, i32
  }
}

</mosaic_0001>

<bundles_post_ra>
// kernel: tpu_custom_call.1
= control target key start
LH: loop header
LB: loop body
LE: loop exit
PB: predicated region body
PF: predicated region fallthrough
CT: control target
= control target key end

     0   :  { %15 = vsyncpa [#allocation3], 0  ;;  %s832_s0 = inlined_call_operand.hbm [shape: f32[8,32], index: 0, kind: input, shape index: {}]   ;;  %s833_s1 = inlined_call_operand.hbm [shape: f32[32,128], index: 1, kind: input, shape index: {}]   ;;  %s834_s2 = inlined_call_operand.vmem [shape: f32[1,128], index: 2, kind: input, shape index: {}]   ;;  %s835_s3 = inlined_call_operand.hbm [shape: f32[128,128], index: 3, kind: input, shape index: {}]   ;;  %s836_s4 = inlined_call_operand.vmem [shape: f32[1,128], index: 4, kind: input, shape index: {}]   ;;  %s837_s5 = inlined_call_operand.hbm [shape: f32[128,128], index: 5, kind: input, shape index: {}]   ;;  %s838_s6 = inlined_call_operand.vmem [shape: f32[1,128], index: 6, kind: input, shape index: {}]   ;;  %s839_s7 = inlined_call_operand.hbm [shape: f32[8,128], index: 7, kind: output, shape index: {0}]   ;;  %s840_s8 = inlined_call_operand.hbm [shape: f32[8,128], index: 8, kind: output, shape index: {1}]   ;;  %s841_s9 = inlined_call_operand.hbm [shape: f32[8,128], index: 9, kind: output, shape index: {2}]  }
   0x1   :  { %16 = vsyncpa [#allocation6], 0 }
   0x2   :  { %17 = vsyncpa [#allocation9], 0 }
   0x3   :  { %18 = vsyncpa [#allocation4], 0 }
   0x4   :  { %19 = vsyncpa [#allocation12], 0  ;;  %s690_s30 = smov [#allocation5]  }
   0x5   :  { %s35_s10 = sshll.u32 %s690_s30, 4  ;;  %s36_s10 = int_to_ptr.vmem [resolvable:$true] %s35_s10 }
   0x6   :  { %s548_s11 = scalar_lea.vmem %s36_s10, 512  ;;  %p553_p1 = scmp.lt.s32.totalorder %s36_s10, %s36_s10 }
   0x7   :  { %p549_p0 = scmp.ne.s32.totalorder %s36_s10, %s548_s11  ;;  %p554_p2 = scmp.lt.s32.totalorder %s548_s11, %s548_s11 }
   0x9   :  { %p555_p3 = por %p554_p2, %p553_p1 }
   0xb   :  { %p556_p4 = pnand %p555_p3, %p549_p0 }
   0xd   :  { %559 = shalt.err (!%p556_p4)
}
   0xe   :  { %s691_s12 = smov 128   ;;  %s692_s13 = smov 8  }
   0xf   :  { %41 = dma.hbm_to_vmem [thread:$0]  %s833_s1, 512, %s36_s10, [#allocation6], %s691_s12, %s691_s12, %s692_s13  }
  0x10   :  { %s693_s16 = smov [#allocation2]   ;;  %s694_s18 = smov [#allocation7]  }
  0x11   :  { %s26_s17 = sshll.u32 %s693_s16, 4  ;;  %s49_s19 = sshll.u32 %s694_s18, 4  ;;  %s27_s17 = int_to_ptr.vmem [resolvable:$true] %s26_s17  ;;  %s50_s19 = int_to_ptr.vmem [resolvable:$true] %s49_s19 }
  0x12   :  { %s568_s20 = scalar_lea.vmem %s27_s17, 128  ;;  %p573_p6 = scmp.lt.s32.totalorder %s27_s17, %s27_s17 }
  0x13   :  { %p569_p5 = scmp.ne.s32.totalorder %s27_s17, %s568_s20  ;;  %p574_p7 = scmp.lt.s32.totalorder %s568_s20, %s568_s20 }
  0x15   :  { %p575_p8 = por %p574_p7, %p573_p6 }
  0x17   :  { %p576_p9 = pnand %p575_p8, %p569_p5 }
  0x19   :  { %579 = shalt.err (!%p576_p9)
}
  0x1a   :  { %29 = dma.hbm_to_vmem [thread:$0]  %s832_s0, 128, %s27_s17, [#allocation3]  }
  0x1b   :  { %s588_s23 = scalar_lea.vmem %s50_s19, 2048  ;;  %p593_p11 = scmp.lt.s32.totalorder %s50_s19, %s50_s19 }
  0x1c   :  { %p589_p10 = scmp.ne.s32.totalorder %s50_s19, %s588_s23  ;;  %p594_p12 = scmp.lt.s32.totalorder %s588_s23, %s588_s23 }
  0x1e   :  { %p595_p13 = por %p594_p12, %p593_p11 }
  0x20   :  { %p596_p0 = pnand %p595_p13, %p589_p10 }
  0x22   :  { %599 = shalt.err (!%p596_p0)
}
  0x23   :  { %55 = dma.hbm_to_vmem [thread:$0]  %s835_s3, 2048, %s50_s19, [#allocation6], %s691_s12, %s691_s12, %s692_s13  }
  0x24   :  { %s695_s25 = smov [#allocation8]  }
  0x25   :  { %s63_s26 = sshll.u32 %s695_s25, 4  ;;  %s64_s26 = int_to_ptr.vmem [resolvable:$true] %s63_s26 }
  0x26   :  { %s608_s27 = scalar_lea.vmem %s64_s26, 2048  ;;  %p613_p2 = scmp.lt.s32.totalorder %s64_s26, %s64_s26 }
  0x27   :  { %p609_p1 = scmp.ne.s32.totalorder %s64_s26, %s608_s27  ;;  %p614_p3 = scmp.lt.s32.totalorder %s608_s27, %s608_s27 }
  0x29   :  { %p615_p4 = por %p614_p3, %p613_p2 }
  0x2b   :  { %p616_p5 = pnand %p615_p4, %p609_p1 }
  0x2d   :  { %619 = shalt.err (!%p616_p5)
}
  0x2e   :  { %69 = dma.hbm_to_vmem [thread:$0]  %s837_s5, 2048, %s64_s26, [#allocation9], %s691_s12, %s691_s12, %s692_s13  }
  0x2f   :  { %680 = dma.done.wait [#allocation3], 128  }
  0x30   :  { %681 = vsyncadd [#allocation3], 4294967168 }
  0x31   :  { %682 = dma.done.wait [#allocation6], 2560  }
  0x32   :  { %683 = vsyncadd [#allocation6], 4294964736 }
  0x33   :  { %684 = dma.done.wait [#allocation9], 2048  }
  0x34   :  { %685 = vsyncadd [#allocation9], 4294965248  ;;  %v696_v0 = vmov 0.0   ;;  %vm697_vm0 = vmmov 0   ;;  %v88_v1 = vld [vmem:[#allocation5 + $0x18] sm:$0xff]  ;;  %v87_v2 = vld [vmem:[#allocation5 + $0x10] sm:$0xff] }
  0x35   :  { %448 = vmatprep.subr.mxu0 %v696_v0  ;;  %456 = vmatprep.mubr.msk.f32.mxu0 %vm697_vm0, %v696_v0  ;;  %v187_v3 = vld [vmem:[#allocation7 + $0x78] sm:$0xff]  ;;  %v86_v4 = vld [vmem:[#allocation5 + $0x8] sm:$0xff]  ;;  %v186_v5 = vld [vmem:[#allocation7 + $0x70] sm:$0xff]  ;;  %vm96_vm1 = vcmask 261120   ;;  %s699_s11 = smov [#allocation10]  }
  0x36   :  { %459 = vmatprep.subr.mxu1 %v696_v0  ;;  %491 = vmatprep.mubr.msk.f32.mxu1 %vm697_vm0, %v696_v0  ;;  %v185_v6 = vld [vmem:[#allocation7 + $0x68] sm:$0xff]  ;;  %v85_v7 = vld [vmem:[#allocation5] sm:$0xff]  ;;  %v84_v8 = vld [vmem:[#allocation2] sm:$0xff]  ;;  %s367_s12 = sshll.u32 %s699_s11, 4  ;;  %s368_s12 = int_to_ptr.vmem [resolvable:$true] %s367_s12 }
  0x37   :  { %449 = vmatpush3.msra.mxu0 %v88_v1  ;;  %460 = vmatpush3.msra.mxu1 %v187_v3  ;;  %v184_v9 = vld [vmem:[#allocation7 + $0x60] sm:$0xff]  ;;  %v183_v10 = vld [vmem:[#allocation7 + $0x58] sm:$0xff]  ;;  %v182_v11 = vld [vmem:[#allocation7 + $0x50] sm:$0xff] }
  0x38   :  { %450 = vmatprep.subr.mxu0 %v696_v0  ;;  %461 = vmatprep.subr.mxu1 %v696_v0  ;;  %v181_v12 = vld [vmem:[#allocation7 + $0x48] sm:$0xff]  ;;  %v180_v13 = vld [vmem:[#allocation7 + $0x40] sm:$0xff]  ;;  %v179_v14 = vld [vmem:[#allocation7 + $0x38] sm:$0xff] }
  0x39   :  { %451 = vmatpush3.msra.mxu0 %v87_v2  ;;  %462 = vmatpush3.msra.mxu1 %v186_v5  ;;  %v178_v15 = vld [vmem:[#allocation7 + $0x30] sm:$0xff]  ;;  %v177_v16 = vld [vmem:[#allocation7 + $0x28] sm:$0xff]  ;;  %v176_v17 = vld [vmem:[#allocation7 + $0x20] sm:$0xff] }
  0x3a   :  { %452 = vmatprep.subr.mxu0 %v696_v0  ;;  %463 = vmatprep.subr.mxu1 %v696_v0  ;;  %v175_v18 = vld [vmem:[#allocation7 + $0x18] sm:$0xff]  ;;  %v174_v19 = vld [vmem:[#allocation7 + $0x10] sm:$0xff]  ;;  %v173_v20 = vld [vmem:[#allocation7 + $0x8] sm:$0xff] }
  0x3b   :  { %453 = vmatpush3.msra.mxu0 %v86_v4  ;;  %464 = vmatpush3.msra.mxu1 %v185_v6  ;;  %v172_v21 = vld [vmem:[#allocation7] sm:$0xff]  ;;  %v282_v22 = vld [vmem:[#allocation8 + $0x78] sm:$0xff]  ;;  %v281_v23 = vld [vmem:[#allocation8 + $0x70] sm:$0xff] }
  0x3c   :  { %454 = vmatprep.subr.mxu0 %v696_v0  ;;  %465 = vmatprep.subr.mxu1 %v696_v0  ;;  %v280_v24 = vld [vmem:[#allocation8 + $0x68] sm:$0xff]  ;;  %v279_v25 = vld [vmem:[#allocation8 + $0x60] sm:$0xff]  ;;  %v278_v26 = vld [vmem:[#allocation8 + $0x58] sm:$0xff] }
  0x3d   :  { %455 = vmatpush3.msra.mxu0 %v85_v7  ;;  %466 = vmatpush3.msra.mxu1 %v184_v9  ;;  %v277_v27 = vld [vmem:[#allocation8 + $0x50] sm:$0xff]  ;;  %v276_v28 = vld [vmem:[#allocation8 + $0x48] sm:$0xff]  ;;  %v275_v29 = vld [vmem:[#allocation8 + $0x40] sm:$0xff] }
  0x3e   :  { %457 = vmatmul.mubr.msk.f32.vlgmr.msra.gmra.mxu0 %vm96_vm1, %v84_v8  ;;  %467 = vmatprep.subr.mxu1 %v696_v0  ;;  %v274_v30 = vld [vmem:[#allocation8 + $0x38] sm:$0xff]  ;;  %v273_v31 = vld [vmem:[#allocation8 + $0x30] sm:$0xff]  ;;  %v272_v32 = vld [vmem:[#allocation8 + $0x28] sm:$0xff] }
  0x3f   :  { %494 = vmatprep.subr.mxu0 %v696_v0  ;;  %468 = vmatpush3.msra.mxu1 %v183_v10  ;;  %v271_v33 = vld [vmem:[#allocation8 + $0x20] sm:$0xff]  ;;  %v270_v34 = vld [vmem:[#allocation8 + $0x18] sm:$0xff]  ;;  %v269_v40 = vld [vmem:[#allocation8 + $0x10] sm:$0xff] }
  0x40   :  { %526 = vmatprep.mubr.msk.f32.mxu0 %vm697_vm0, %v696_v0  ;;  %469 = vmatprep.subr.mxu1 %v696_v0  ;;  %v405_v35 = vld [vmem:[%s834_s2] ss:$0 sm:$0xff]  ;;  %v268_v41 = vld [vmem:[#allocation8 + $0x8] sm:$0xff]  ;;  %v267_v42 = vld [vmem:[#allocation8] sm:$0xff]  ;;  %s698_s2 = smov [#allocation11]  }
  0x41   :  { %470 = vmatpush3.msra.mxu1 %v182_v11  ;;  %495 = vmatpush3.msra.mxu0 %v282_v22  ;;  %v407_v43 = vld [vmem:[%s836_s4] ss:$0 sm:$0xff]  ;;  %s377_s10 = sshll.u32 %s698_s2, 4  ;;  %s378_s10 = int_to_ptr.vmem [resolvable:$true] %s377_s10 }
  0x42   :  { %471 = vmatprep.subr.mxu1 %v696_v0  ;;  %496 = vmatprep.subr.mxu0 %v696_v0  ;;  %s620_s13 = scalar_lea.vmem %s378_s10, 128  ;;  %p625_p7 = scmp.lt.s32.totalorder %s378_s10, %s378_s10 }
  0x43   :  { %472 = vmatpush3.msra.mxu1 %v181_v12  ;;  %497 = vmatpush3.msra.mxu0 %v281_v23  ;;  %p621_p6 = scmp.ne.s32.totalorder %s378_s10, %s620_s13  ;;  %p626_p8 = scmp.lt.s32.totalorder %s620_s13, %s620_s13 }
  0x44   :  { %473 = vmatprep.subr.mxu1 %v696_v0  ;;  %498 = vmatprep.subr.mxu0 %v696_v0 }
  0x45   :  { %474 = vmatpush3.msra.mxu1 %v180_v13  ;;  %499 = vmatpush3.msra.mxu0 %v280_v24  ;;  %p627_p9 = por %p626_p8, %p625_p7 }
  0x46   :  { %475 = vmatprep.subr.mxu1 %v696_v0  ;;  %500 = vmatprep.subr.mxu0 %v696_v0 }
  0x47   :  { %476 = vmatpush3.msra.mxu1 %v179_v14  ;;  %501 = vmatpush3.msra.mxu0 %v279_v25  ;;  %p628_p10 = pnand %p627_p9, %p621_p6 }
  0x48   :  { %477 = vmatprep.subr.mxu1 %v696_v0  ;;  %502 = vmatprep.subr.mxu0 %v696_v0 }
  0x49   :  { %478 = vmatpush3.msra.mxu1 %v178_v15  ;;  %503 = vmatpush3.msra.mxu0 %v278_v26 }
  0x4a   :  { %479 = vmatprep.subr.mxu1 %v696_v0  ;;  %504 = vmatprep.subr.mxu0 %v696_v0 }
  0x4b   :  { %480 = vmatpush3.msra.mxu1 %v177_v16  ;;  %505 = vmatpush3.msra.mxu0 %v277_v27 }
  0x4c   :  { %481 = vmatprep.subr.mxu1 %v696_v0  ;;  %506 = vmatprep.subr.mxu0 %v696_v0 }
  0x4d   :  { %482 = vmatpush3.msra.mxu1 %v176_v17  ;;  %507 = vmatpush3.msra.mxu0 %v276_v28 }
  0x4e   :  { %483 = vmatprep.subr.mxu1 %v696_v0  ;;  %508 = vmatprep.subr.mxu0 %v696_v0 }
  0x4f   :  { %484 = vmatpush3.msra.mxu1 %v175_v18  ;;  %509 = vmatpush3.msra.mxu0 %v275_v29 }
  0x50   :  { %485 = vmatprep.subr.mxu1 %v696_v0  ;;  %510 = vmatprep.subr.mxu0 %v696_v0 }
  0x51   :  { %486 = vmatpush3.msra.mxu1 %v174_v19  ;;  %511 = vmatpush3.msra.mxu0 %v274_v30 }
  0x52   :  { %487 = vmatprep.subr.mxu1 %v696_v0  ;;  %512 = vmatprep.subr.mxu0 %v696_v0 }
  0x53   :  { %488 = vmatpush3.msra.mxu1 %v173_v20  ;;  %513 = vmatpush3.msra.mxu0 %v273_v31 }
  0x54   :  { %489 = vmatprep.subr.mxu1 %v696_v0  ;;  %514 = vmatprep.subr.mxu0 %v696_v0 }
  0x55   :  { %490 = vmatpush3.msra.mxu1 %v172_v21  ;;  %515 = vmatpush3.msra.mxu0 %v272_v32 }
  0x56   :  { %516 = vmatprep.subr.mxu0 %v696_v0 }
  0x57   :  { %517 = vmatpush3.msra.mxu0 %v271_v33 }
  0x58   :  { %518 = vmatprep.subr.mxu0 %v696_v0 }
  0x59   :  { %519 = vmatpush3.msra.mxu0 %v270_v34 }
  0x5a   :  { %520 = vmatprep.subr.mxu0 %v696_v0 }
  0x5b   :  { %521 = vmatpush3.msra.mxu0 %v269_v40 }
  0x5c   :  { %522 = vmatprep.subr.mxu0 %v696_v0 }
  0x5d   :  { %523 = vmatpush3.msra.mxu0 %v268_v41 }
  0x5e   :  { %524 = vmatprep.subr.mxu0 %v696_v0 }
  0x5f   :  { %525 = vmatpush3.msra.mxu0 %v267_v42 }
  0xfe   :  { %v166_v36 = vpop.f32.mrf.mxu0 }
  0xff   :  { %v167_v37 = vadd.f32 %v405_v35, %v166_v36 }
 0x100   :  { %v458_v38 = vpop.f32.mrf.mxu0 }
 0x101   :  { %v171_v39 = vmax.f32 %v167_v37, 0.0  ;;  %170 = vst [vmem:[#allocation10] sm:$0xff] %v167_v37 }
 0x103   :  { %492 = vmatmul.mubr.f32.vlgmr.msra.gmra.mxu1 %v171_v39 }
 0x1c3   :  { %v261_v44 = vpop.f32.mrf.mxu1 }
 0x1c4   :  { %v262_v45 = vadd.f32 %v407_v43, %v261_v44 }
 0x1c5   :  { %v493_v46 = vpop.f32.mrf.mxu1 }
 0x1c6   :  { %v266_v47 = vmax.f32 %v262_v45, 0.0  ;;  %265 = vst [vmem:[#allocation11] sm:$0xff] %v262_v45 }
 0x1c8   :  { %527 = vmatmul.mubr.f32.vlgmr.msra.gmra.mxu0 %v266_v47 }
 0x1c9   :  { %631 = shalt.err (!%p628_p10)
}
 0x1ca   :  { %380 = dma.vmem_to_hbm [thread:$0]  %s378_s10, 128, %s840_s8, [#allocation12]  }
 0x1cb   :  { %s640_s15 = scalar_lea.vmem %s368_s12, 128  ;;  %p645_p12 = scmp.lt.s32.totalorder %s368_s12, %s368_s12 }
 0x1cc   :  { %p641_p11 = scmp.ne.s32.totalorder %s368_s12, %s640_s15  ;;  %p646_p13 = scmp.lt.s32.totalorder %s640_s15, %s640_s15 }
 0x1ce   :  { %p647_p0 = por %p646_p13, %p645_p12 }
 0x1d0   :  { %p648_p1 = pnand %p647_p0, %p641_p11 }
 0x1d2   :  { %651 = shalt.err (!%p648_p1)
}
 0x1d3   :  { %370 = dma.vmem_to_hbm [thread:$0]  %s368_s12, 128, %s839_s7, [#allocation4]   ;;  %v408_v48 = vld [vmem:[%s838_s6] ss:$0 sm:$0xff] }
 0x1d4   :  { %s700_s20 = smov [#allocation13]  }
 0x1d5   :  { %s387_s21 = sshll.u32 %s700_s20, 4  ;;  %s388_s21 = int_to_ptr.vmem [resolvable:$true] %s387_s21 }
 0x1d6   :  { %s660_s8 = scalar_lea.vmem %s388_s21, 128  ;;  %p665_p3 = scmp.lt.s32.totalorder %s388_s21, %s388_s21 }
 0x1d7   :  { %p661_p2 = scmp.ne.s32.totalorder %s388_s21, %s660_s8  ;;  %p666_p4 = scmp.lt.s32.totalorder %s660_s8, %s660_s8 }
 0x1d9   :  { %p667_p5 = por %p666_p4, %p665_p3 }
 0x1db   :  { %p668_p6 = pnand %p667_p5, %p661_p2 }
 0x288   :  { %v356_v49 = vpop.f32.mrf.mxu0 }
 0x289   :  { %v357_v50 = vadd.f32 %v408_v48, %v356_v49 }
 0x28a   :  { %v528_v51 = vpop.f32.mrf.mxu0 }
 0x28b   :  { %360 = vst [vmem:[#allocation13] sm:$0xff] %v357_v50 }
 0x28c   :  { %671 = shalt.err (!%p668_p6)
}
 0x28d   :  { %390 = dma.vmem_to_hbm [thread:$0]  %s388_s21, 128, %s841_s9, [#allocation12]  }
 0x28e   :  { %686 = dma.done.wait [#allocation4], 128  }
 0x28f   :  { %687 = vsyncadd [#allocation4], 4294967168 }
 0x290   :  { %688 = dma.done.wait [#allocation12], 256  }
 0x291   :  { %689 = vsyncadd [#allocation12], 4294967040 }
 0x292   :  { %400 = vsyncpa [#allocation3], 1 }
 0x293   :  { %401 = vsyncpa [#allocation6], 1 }
 0x294   :  { %402 = vsyncpa [#allocation9], 1 }
 0x295   :  { %403 = vsyncpa [#allocation4], 1 }
 0x296   :  { %404 = vsyncpa [#allocation12], 1 }

</bundles_post_ra>
